<compile_context>
chip_gen: v7x
topology: tpu7x:2x2x1
jax: 0.10.0
libtpu: 0.0.40
codegen_flags: <defaults>
</compile_context>

<pallas_src>
import jax
import jax.numpy as jnp
from jax.experimental import pallas as pl
from jax.experimental.pallas import tpu as pltpu


def _routing_kernel(x_ref, wt_ref, out_ref):
    # x_ref:   [B_TILE, F]  (VMEM, pipelined over the batch grid)
    # wt_ref:  [F, C]       (VMEM, resident across grid steps)
    # out_ref: [B_TILE, C]  (VMEM, module-native layout; no host transpose)
    logits = jnp.dot(x_ref[...], wt_ref[...],
                     preferred_element_type=jnp.float32)      # MXU, f32 acc

    # Numerically-stable softmax over the capsule (lane) axis, all in f32.
    m = jnp.max(logits, axis=-1, keepdims=True)
    e = jnp.exp(logits - m)
    denom = jnp.sum(e, axis=-1, keepdims=True)
    attention = e / denom                    # exact divide: rows sum to 1

    out_ref[...] = attention.astype(out_ref.dtype)


def _round_up(v, m):
    return (v + m - 1) // m * m


def _pick_b_tile(B, F, C, in_itemsize, out_itemsize):
    """Largest lane-friendly batch tile whose double-buffered (padded) x and
    out slabs fit a conservative VMEM budget; keeps >=2 grid steps for large
    batches so v7x can shard the grid across its 2 TensorCores."""
    f_pad = _round_up(F, 128)
    c_pad = _round_up(C, 128)
    per_row = 2 * f_pad * in_itemsize + 2 * c_pad * out_itemsize  # dbl-buffered
    budget = 16 * 1024 * 1024
    t = (budget // max(per_row, 1)) // 128 * 128
    t = int(max(128, min(t, 8192)))
    if B > 256:
        # keep the grid >= 2 steps (v7x megacore); no effect on v5e/v6e.
        t = min(t, _round_up(pl.cdiv(B, 2), 128))
    t = min(t, _round_up(B, 128))
    return t


def routing_layer(x, route_weights, *, io_dtype=None, out_dtype=None,
                  use_pallas=None):
    """x: [B, in_features], route_weights: [num_capsules, in_features].
    Returns attention [B, num_capsules] = softmax(x @ W.T, axis=1)."""
    B, F = x.shape
    C, F2 = route_weights.shape
    assert F == F2

    if out_dtype is None:
        out_dtype = x.dtype
    if use_pallas is None:
        # At tiny B the pallas_call is launch/step-overhead dominated; let XLA
        # fuse the matmul+softmax instead.
        use_pallas = B >= 512

    if not use_pallas:
        logits = jnp.dot(x, route_weights.T, preferred_element_type=jnp.float32)
        return jax.nn.softmax(logits, axis=1).astype(out_dtype)

    # Low-precision cast at the call boundary (shrinks the HBM read stream);
    # the softmax math inside the kernel remains f32.
    if io_dtype is not None:
        x = x.astype(io_dtype)
        route_weights = route_weights.astype(io_dtype)
    w_t = route_weights.T                       # [F, C], tiny one-time transpose

    in_itemsize = jnp.dtype(x.dtype).itemsize
    w_itemsize = jnp.dtype(w_t.dtype).itemsize
    out_itemsize = jnp.dtype(out_dtype).itemsize

    b_tile = _pick_b_tile(B, F, C, in_itemsize, out_itemsize)

    # Pad batch to a multiple of the tile; padded zero rows give a harmless
    # uniform softmax and are sliced off below.
    n_blocks = pl.cdiv(B, b_tile)
    b_pad = n_blocks * b_tile
    if b_pad != B:
        x = jnp.pad(x, ((0, b_pad - B), (0, 0)))

    # VMEM accounting with lane padding (F, C rounded to 128 lanes).
    f_pad = _round_up(F, 128)
    c_pad = _round_up(C, 128)
    block_bytes = (
        2 * b_tile * f_pad * in_itemsize        # x (double-buffered)
        + 2 * b_tile * c_pad * out_itemsize     # out (double-buffered)
        + 2 * _round_up(F, 8) * c_pad * w_itemsize   # W.T (small, resident)
    )
    vmem_limit = int(min(max(block_bytes + (4 << 20), 8 << 20), 40 << 20))

    cost = pl.CostEstimate(
        flops=2 * b_pad * F * C,
        transcendentals=b_pad * C,
        bytes_accessed=(b_pad * F * in_itemsize
                        + F * C * w_itemsize
                        + b_pad * C * out_itemsize),
    )

    out = pl.pallas_call(
        _routing_kernel,
        out_shape=jax.ShapeDtypeStruct((b_pad, C), out_dtype),
        grid_spec=pltpu.PrefetchScalarGridSpec(
            num_scalar_prefetch=0,
            grid=(n_blocks,),
            in_specs=[
                pl.BlockSpec((b_tile, F), lambda i: (i, 0)),   # x tile
                pl.BlockSpec((F, C), lambda i: (0, 0)),        # W.T resident
            ],
            out_specs=pl.BlockSpec((b_tile, C), lambda i: (i, 0)),
        ),
        compiler_params=pltpu.CompilerParams(
            dimension_semantics=("parallel",),   # megacore-shardable on v7x
            vmem_limit_bytes=vmem_limit,
        ),
        cost_estimate=cost,
    )(x, w_t)

    return out[:B] if b_pad != B else out


def routing_layer_ref(x, route_weights):
    logits = x @ route_weights.T
    return jax.nn.softmax(logits, axis=1)


if __name__ == "__main__":
    key = jax.random.PRNGKey(0)
    k_x, k_w = jax.random.split(key)

    batch = 8
    in_features = 32
    num_capsules = 16

    x = jax.random.normal(k_x, (batch, in_features), dtype=jnp.float32)
    # Deterministic init mirroring torch.randn(num_capsules, in_features)
    route_weights = jax.random.normal(
        k_w, (num_capsules, in_features), dtype=jnp.float32
    )

    ref = routing_layer_ref(x, route_weights)

    # f32 Pallas path (forced so the kernel actually runs at this small batch).
    out = jax.block_until_ready(routing_layer(x, route_weights, use_pallas=True))
    assert out.shape == (batch, num_capsules)
    assert jnp.allclose(out, ref, atol=2e-3, rtol=2e-3)
    assert jnp.allclose(jnp.sum(out, axis=1), jnp.ones((batch,)), atol=1e-4)

    # bf16 I/O path: inputs cast at the call boundary, softmax stays f32,
    # narrower bf16 output writeback.
    out_bf16 = jax.block_until_ready(
        routing_layer(x, route_weights, use_pallas=True,
                      io_dtype=jnp.bfloat16, out_dtype=jnp.bfloat16)
    )
    assert out_bf16.shape == (batch, num_capsules)
    assert out_bf16.dtype == jnp.bfloat16
    out_bf16_f32 = out_bf16.astype(jnp.float32)
    assert jnp.allclose(out_bf16_f32, ref, atol=2e-2, rtol=2e-2)
    assert jnp.allclose(jnp.sum(out_bf16_f32, axis=1), jnp.ones((batch,)),
                        atol=2e-2)

    # Larger batch exercises a multi-block grid (>= 2 steps for v7x megacore).
    xb = jax.random.normal(k_x, (1024, in_features), dtype=jnp.float32)
    refb = routing_layer_ref(xb, route_weights)
    outb = jax.block_until_ready(routing_layer(xb, route_weights))
    assert outb.shape == (1024, num_capsules)
    assert jnp.allclose(outb, refb, atol=2e-3, rtol=2e-3)

    # Small-batch auto-dispatch (plain fused XLA path).
    out_small = jax.block_until_ready(routing_layer(x, route_weights))
    assert jnp.allclose(out_small, ref, atol=2e-3, rtol=2e-3)

    print("KERNEL_OK")
</pallas_src>

<mosaic_0001>
module attributes {stable_mosaic.version = 11 : i64} {
  func.func @_routing_kernel(%arg0: i32, %arg1: memref<128x32xf32, #tpu.memory_space<vmem>>, %arg2: memref<32x16xf32, #tpu.memory_space<vmem>>, %arg3: memref<128x16xf32, #tpu.memory_space<vmem>>) attributes {dimension_semantics = [#tpu.dimension_semantics<parallel>], iteration_bounds = array<i64: 1>, scalar_prefetch = 0 : i64, scratch_operands = 0 : i64, tpu.core_type = #tpu.core_type<tc>, window_params = [{transform_indices = @transform_0, window_bounds = array<i64: 128, 32>}, {pipeline_mode = #tpu.pipeline_mode<synchronous>, transform_indices = @transform_1, window_bounds = array<i64: 32, 16>}, {transform_indices = @transform_2, window_bounds = array<i64: 128, 16>}]} {
    %c0 = arith.constant 0 : index
    %c0_0 = arith.constant 0 : index
    %0 = vector.load %arg1[%c0, %c0_0] : memref<128x32xf32, #tpu.memory_space<vmem>>, vector<128x32xf32>
    %c0_1 = arith.constant 0 : index
    %c0_2 = arith.constant 0 : index
    %1 = vector.load %arg2[%c0_1, %c0_2] : memref<32x16xf32, #tpu.memory_space<vmem>>, vector<32x16xf32>
    %cst = arith.constant dense<0.000000e+00> : vector<128x16xf32>
    %2 = tpu.matmul %0, %1, %cst {dimension_numbers = #tpu.dot_dimension_numbers<[1], [0], [0], [1], [0, 0, 1, 1], [], []>} : vector<128x32xf32>, vector<32x16xf32>, vector<128x16xf32> -> vector<128x16xf32>
    %cst_3 = arith.constant dense<0xFF800000> : vector<128xf32>
    %3 = vector.multi_reduction <maximumf>, %2, %cst_3 [1] : vector<128x16xf32> to vector<128xf32>
    %4 = vector.shape_cast %3 : vector<128xf32> to vector<128x1xf32>
    %5 = vector.broadcast %4 : vector<128x1xf32> to vector<128x16xf32>
    %6 = arith.subf %2, %5 : vector<128x16xf32>
    %7 = math.exp %6 : vector<128x16xf32>
    %cst_4 = arith.constant dense<0.000000e+00> : vector<128xf32>
    %8 = vector.multi_reduction <add>, %7, %cst_4 [1] : vector<128x16xf32> to vector<128xf32>
    %9 = vector.shape_cast %8 : vector<128xf32> to vector<128x1xf32>
    %10 = vector.broadcast %9 : vector<128x1xf32> to vector<128x16xf32>
    %11 = arith.divf %7, %10 : vector<128x16xf32>
    %c0_5 = arith.constant 0 : index
    %c0_6 = arith.constant 0 : index
    %12 = vector.load %arg3[%c0_5, %c0_6] : memref<128x16xf32, #tpu.memory_space<vmem>>, vector<128x16xf32>
    tpu.vector_store %arg3[%c0_5, %c0_6], %11 {strides = array<i32>} : memref<128x16xf32, #tpu.memory_space<vmem>>, vector<128x16xf32>,
    return
  }
  func.func @transform_0(%arg0: i32) -> (i32, i32) {
    %c0_i32 = arith.constant 0 : i32
    %c0_i32_0 = arith.constant 0 : i32
    return %arg0, %c0_i32 : i32, i32
  }
  func.func @transform_1(%arg0: i32) -> (i32, i32) {
    %c0_i32 = arith.constant 0 : i32
    %c0_i32_0 = arith.constant 0 : i32
    %c0_i32_1 = arith.constant 0 : i32
    return %c0_i32, %c0_i32_0 : i32, i32
  }
  func.func @transform_2(%arg0: i32) -> (i32, i32) {
    %c0_i32 = arith.constant 0 : i32
    %c0_i32_0 = arith.constant 0 : i32
    return %arg0, %c0_i32 : i32, i32
  }
}

</mosaic_0001>

<bundles_post_ra>
// kernel: tpu_custom_call.1
= control target key start
LH: loop header
LB: loop body
LE: loop exit
PB: predicated region body
PF: predicated region fallthrough
CT: control target
= control target key end

     0   :  { %vm31_vm0 = vcmask 261120   ;;  %vm225_vm1 = vcmask 130048   ;;  %s861_s1 = inlined_call_operand.vmem [shape: f32[32,16], index: 1, kind: input, shape index: {}]   ;;  %s862_s0 = inlined_call_operand.vmem [shape: f32[128,32], index: 0, kind: input, shape index: {}]   ;;  %s863_s2 = inlined_call_operand.vmem [shape: f32[128,16], index: 2, kind: output, shape index: {}]  }
   0x1   :  { %v27_v0 = vld [vmem:[%s861_s1] sm:$0xff]  ;;  %v28_v1 = vld [vmem:[%s861_s1 + $0x8] sm:$0xff]  ;;  %v29_v2 = vld [vmem:[%s861_s1 + $0x10] sm:$0xff] }
   0x2   :  { %v490_v3 = vpack.c.bf16 %v28_v1, %v27_v0  ;;  %v30_v4 = vld [vmem:[%s861_s1 + $0x18] sm:$0xff]  ;;  %v11_v5 = vld [vmem:[%s862_s0] sm:$0xff]  ;;  %v12_v8 = vld [vmem:[%s862_s0 + $0x8] sm:$0xff] }
   0x3   :  { %v19_v6 = vld [vmem:[%s862_s0 + $0x40] sm:$0xff]  ;;  %v494_v7 = vpack.c.bf16 %v30_v4, %v29_v2  ;;  %466 = vmatprep.mubr.msk.f32.mxu0 %vm31_vm0, %v11_v5  ;;  %v20_v9 = vld [vmem:[%s862_s0 + $0x48] sm:$0xff]  ;;  %v13_v10 = vld [vmem:[%s862_s0 + $0x10] sm:$0xff] }
   0x4   :  { %478 = vmatprep.mubr.msk.f32.mxu1 %vm31_vm0, %v19_v6  ;;  %491 = vmatprep.subr.bf16.mxu0 %v490_v3  ;;  %v21_v11 = vld [vmem:[%s862_s0 + $0x50] sm:$0xff]  ;;  %v14_v12 = vld [vmem:[%s862_s0 + $0x18] sm:$0xff]  ;;  %v15_v14 = vld [vmem:[%s862_s0 + $0x20] sm:$0xff] }
   0x5   :  { %498 = vmatprep.subr.bf16.mxu1 %v490_v3  ;;  %493 = vmatpush3.bf16.msra.mxu0 %v490_v3  ;;  %v22_v13 = vld [vmem:[%s862_s0 + $0x58] sm:$0xff]  ;;  %v23_v15 = vld [vmem:[%s862_s0 + $0x60] sm:$0xff]  ;;  %v16_v16 = vld [vmem:[%s862_s0 + $0x28] sm:$0xff] }
   0x6   :  { %500 = vmatpush3.bf16.msra.mxu1 %v490_v3  ;;  %495 = vmatprep.subr.bf16.mxu0 %v494_v7  ;;  %v24_v17 = vld [vmem:[%s862_s0 + $0x68] sm:$0xff]  ;;  %v17_v18 = vld [vmem:[%s862_s0 + $0x30] sm:$0xff]  ;;  %v18_v20 = vld [vmem:[%s862_s0 + $0x38] sm:$0xff] }
   0x7   :  { %499 = vmatprep.subr.bf16.mxu1 %v494_v7  ;;  %v25_v19 = vld [vmem:[%s862_s0 + $0x70] sm:$0xff]  ;;  %v26_v21 = vld [vmem:[%s862_s0 + $0x78] sm:$0xff] }
   0x9   :  { %497 = vmatpush3.bf16.msra.mxu0 %v494_v7 }
   0xa   :  { %501 = vmatpush3.bf16.msra.mxu1 %v494_v7 }
   0xc   :  { %467 = vmatmul.mubr.msk.f32.vlgmr.msra.gmra.mrb[0].mxu0 %vm31_vm0, %v12_v8 }
   0xd   :  { %479 = vmatmul.mubr.msk.f32.vlgmr.msra.gmra.mrb[0].mxu1 %vm31_vm0, %v20_v9  ;;  %469 = vmatprep.mubr.msk.f32.mxu0 %vm31_vm0, %v13_v10 }
   0xe   :  { %481 = vmatprep.mubr.msk.f32.mxu1 %vm31_vm0, %v21_v11 }
  0x10   :  { %470 = vmatmul.mubr.msk.f32.gmra.mrb[2].mxu0 %vm31_vm0, %v14_v12 }
  0x11   :  { %482 = vmatmul.mubr.msk.f32.gmra.mrb[2].mxu1 %vm31_vm0, %v22_v13  ;;  %472 = vmatprep.mubr.msk.f32.mxu0 %vm31_vm0, %v15_v14 }
  0x12   :  { %484 = vmatprep.mubr.msk.f32.mxu1 %vm31_vm0, %v23_v15 }
  0x14   :  { %473 = vmatmul.mubr.msk.f32.gmra.mrb[4].mxu0 %vm31_vm0, %v16_v16 }
  0x15   :  { %485 = vmatmul.mubr.msk.f32.gmra.mrb[4].mxu1 %vm31_vm0, %v24_v17  ;;  %475 = vmatprep.mubr.msk.f32.mxu0 %vm31_vm0, %v17_v18 }
  0x16   :  { %487 = vmatprep.mubr.msk.f32.mxu1 %vm31_vm0, %v25_v19 }
  0x18   :  { %476 = vmatmul.mubr.msk.f32.gmra.mrb[6].mxu0 %vm31_vm0, %v18_v20 }
  0x19   :  { %488 = vmatmul.mubr.msk.f32.gmra.mrb[6].mxu1 %vm31_vm0, %v26_v21 }
  0xdf   :  { %v468_v22 = vpop.f32.mrb[0].mxu0 }
  0xe0   :  { %v480_v23 = vpop.f32.mrb[0].mxu1  ;;  %v146_v24 = vpop.f32.mrb[1].mxu0  ;;  %v229_v27 = vsel %vm225_vm1, %v468_v22, -inf }
  0xe1   :  { %v657_v25 = vpop.f32.mrb[1].mxu1  ;;  %v253_v26 = vsel %vm225_vm1, %v480_v23, -inf  ;;  %230 = vmax.xlane.f32.xlu0 %v229_v27  ;;  %v226_v31 = vsel %vm225_vm1, %v146_v24, -inf }
  0xe2   :  { %254 = vmax.xlane.f32.xlu1 %v253_v26  ;;  %v250_v37 = vsel %vm225_vm1, %v657_v25, -inf }
  0xe3   :  { %v471_v28 = vpop.f32.mrb[2].mxu0 }
  0xe4   :  { %v483_v29 = vpop.f32.mrb[2].mxu1  ;;  %v661_v30 = vpop.f32.mrb[3].mxu0  ;;  %v235_v32 = vsel %vm225_vm1, %v471_v28, -inf }
  0xe5   :  { %v665_v33 = vpop.f32.mrb[3].mxu1  ;;  %227 = vmax.xlane.f32.xlu0 %v226_v31  ;;  %v259_v34 = vsel %vm225_vm1, %v483_v29, -inf  ;;  %v232_v43 = vsel %vm225_vm1, %v661_v30, -inf }
  0xe6   :  { %236 = vmax.xlane.f32.xlu1 %v235_v32  ;;  %v256_v42 = vsel %vm225_vm1, %v665_v33, -inf }
  0xe7   :  { %v668_v35 = vpop.f32.mrb[4].mxu0 }
  0xe8   :  { %v670_v36 = vpop.f32.mrb[4].mxu1  ;;  %v674_v38 = vpop.f32.mrb[5].mxu0  ;;  %v241_v46 = vsel %vm225_vm1, %v668_v35, -inf }
  0xe9   :  { %v676_v39 = vpop.f32.mrb[5].mxu1  ;;  %251 = vmax.xlane.f32.xlu0 %v250_v37  ;;  %v238_v47 = vsel %vm225_vm1, %v674_v38, -inf  ;;  %v265_v48 = vsel %vm225_vm1, %v670_v36, -inf }
  0xea   :  { %260 = vmax.xlane.f32.xlu1 %v259_v34  ;;  %v262_v49 = vsel %vm225_vm1, %v676_v39, -inf }
  0xeb   :  { %v678_v40 = vpop.f32.mrb[6].mxu0 }
  0xec   :  { %v680_v41 = vpop.f32.mrb[6].mxu1  ;;  %v686_v44 = vpop.f32.mrb[7].mxu0  ;;  %v247_v50 = vsel %vm225_vm1, %v678_v40, -inf }
  0xed   :  { %v688_v45 = vpop.f32.mrb[7].mxu1  ;;  %257 = vmax.xlane.f32.xlu0 %v256_v42  ;;  %v244_v51 = vsel %vm225_vm1, %v686_v44, -inf  ;;  %v271_v52 = vsel %vm225_vm1, %v680_v41, -inf }
  0xee   :  { %233 = vmax.xlane.f32.xlu1 %v232_v43  ;;  %v268_v53 = vsel %vm225_vm1, %v688_v45, -inf }
  0xf1   :  { %239 = vmax.xlane.f32.xlu0 %v238_v47 }
  0xf2   :  { %242 = vmax.xlane.f32.xlu1 %v241_v46 }
  0xf5   :  { %263 = vmax.xlane.f32.xlu0 %v262_v49 }
  0xf6   :  { %266 = vmax.xlane.f32.xlu1 %v265_v48 }
  0xf9   :  { %245 = vmax.xlane.f32.xlu0 %v244_v51 }
  0xfa   :  { %248 = vmax.xlane.f32.xlu1 %v247_v50 }
  0xfd   :  { %269 = vmax.xlane.f32.xlu0 %v268_v53 }
  0xfe   :  { %272 = vmax.xlane.f32.xlu1 %v271_v52 }
 0x16e   :  { %v231_v55 = vpop.xlane.xlu0 %230 }
 0x16f   :  { %v255_v54 = vpop.xlane.xlu1 %254  ;;  %v275_v57 = vsub.f32 %v468_v22, %v231_v55 }
 0x170   :  { %v283_v56 = vsub.f32 %v480_v23, %v255_v54 }
 0x171   :  { %v292_v58 = vmul.f32 1.442695, %v275_v57 }
 0x172   :  { %v308_v59 = vmul.f32 1.442695, %v283_v56  ;;  %v228_v60 = vpop.xlane.xlu0 %227 }
 0x173   :  { %v237_v61 = vpop.xlane.xlu1 %236  ;;  %v274_v62 = vsub.f32 %v146_v24, %v228_v60  ;;  %502 = vpow2.f32 %v292_v58 }
 0x174   :  { %v277_v63 = vsub.f32 %v471_v28, %v237_v61  ;;  %504 = vpow2.f32 %v308_v59 }
 0x175   :  { %v290_v0 = vmul.f32 1.442695, %v274_v62 }
 0x176   :  { %v296_v1 = vmul.f32 1.442695, %v277_v63  ;;  %v252_v2 = vpop.xlane.xlu0 %251 }
 0x177   :  { %v261_v3 = vpop.xlane.xlu1 %260  ;;  %506 = vpow2.f32 %v290_v0  ;;  %v282_v4 = vsub.f32 %v657_v25, %v252_v2 }
 0x178   :  { %v285_v5 = vsub.f32 %v483_v29, %v261_v3  ;;  %508 = vpow2.f32 %v296_v1 }
 0x179   :  { %v306_v6 = vmul.f32 1.442695, %v282_v4 }
 0x17a   :  { %v312_v7 = vmul.f32 1.442695, %v285_v5  ;;  %v258_v8 = vpop.xlane.xlu0 %257 }
 0x17b   :  { %v234_v9 = vpop.xlane.xlu1 %233  ;;  %510 = vpow2.f32 %v306_v6  ;;  %v284_v10 = vsub.f32 %v665_v33, %v258_v8 }
 0x17c   :  { %v276_v11 = vsub.f32 %v661_v30, %v234_v9  ;;  %512 = vpow2.f32 %v312_v7 }
 0x17d   :  { %v709_v13 = vpop.eup %502  ;;  %v310_v14 = vmul.f32 1.442695, %v284_v10 }
 0x17e   :  { %v294_v12 = vmul.f32 1.442695, %v276_v11  ;;  %v240_v16 = vpop.xlane.xlu0 %239  ;;  %v325_v19 = vsel %vm225_vm1, %v709_v13, 0.0  ;;  %v715_v20 = vpop.eup %504 }
 0x17f   :  { %v243_v15 = vpop.xlane.xlu1 %242  ;;  %v278_v18 = vsub.f32 %v674_v38, %v240_v16  ;;  %326 = vadd.xlane.f32.xlu1 %v325_v19  ;;  %v349_v29 = vsel %vm225_vm1, %v715_v20, 0.0 }
 0x180   :  { %v279_v17 = vsub.f32 %v668_v35, %v243_v15  ;;  %514 = vpow2.f32 %v294_v12 }
 0x181   :  { %v717_v21 = vpop.eup %506  ;;  %516 = vpow2.f32 %v310_v14  ;;  %v298_v23 = vmul.f32 1.442695, %v278_v18 }
 0x182   :  { %v300_v22 = vmul.f32 1.442695, %v279_v17  ;;  %v264_v25 = vpop.xlane.xlu0 %263  ;;  %v322_v26 = vsel %vm225_vm1, %v717_v21, 0.0  ;;  %v725_v30 = vpop.eup %508 }
 0x183   :  { %v267_v24 = vpop.xlane.xlu1 %266  ;;  %v286_v28 = vsub.f32 %v676_v39, %v264_v25  ;;  %323 = vadd.xlane.f32.xlu0 %v322_v26  ;;  %350 = vadd.xlane.f32.xlu1 %v349_v29  ;;  %v331_v42 = vsel %vm225_vm1, %v725_v30, 0.0 }
 0x184   :  { %518 = vpow2.f32 %v300_v22  ;;  %v287_v27 = vsub.f32 %v670_v36, %v267_v24 }
 0x185   :  { %v727_v31 = vpop.eup %510  ;;  %520 = vpow2.f32 %v298_v23  ;;  %v314_v33 = vmul.f32 1.442695, %v286_v28 }
 0x186   :  { %v316_v32 = vmul.f32 1.442695, %v287_v27  ;;  %v246_v35 = vpop.xlane.xlu0 %245  ;;  %v346_v37 = vsel %vm225_vm1, %v727_v31, 0.0  ;;  %v731_v36 = vpop.eup %512 }
 0x187   :  { %v249_v34 = vpop.xlane.xlu1 %248  ;;  %v280_v39 = vsub.f32 %v686_v44, %v246_v35  ;;  %347 = vadd.xlane.f32.xlu0 %v346_v37  ;;  %332 = vadd.xlane.f32.xlu1 %v331_v42  ;;  %v355_v50 = vsel %vm225_vm1, %v731_v36, 0.0 }
 0x188   :  { %522 = vpow2.f32 %v316_v32  ;;  %v281_v38 = vsub.f32 %v678_v40, %v249_v34 }
 0x189   :  { %524 = vpow2.f32 %v314_v33  ;;  %v302_v47 = vmul.f32 1.442695, %v280_v39 }
 0x18a   :  { %v304_v43 = vmul.f32 1.442695, %v281_v38  ;;  %v737_v46 = vpop.eup %514  ;;  %v270_v49 = vpop.xlane.xlu0 %269 }
 0x18b   :  { %v273_v48 = vpop.xlane.xlu1 %272  ;;  %v288_v44 = vsub.f32 %v688_v45, %v270_v49  ;;  %v328_v51 = vsel %vm225_vm1, %v737_v46, 0.0  ;;  %v745_v52 = vpop.eup %516  ;;  %356 = vadd.xlane.f32.xlu1 %v355_v50 }
 0x18c   :  { %526 = vpow2.f32 %v304_v43  ;;  %v289_v40 = vsub.f32 %v680_v41, %v273_v48  ;;  %329 = vadd.xlane.f32.xlu0 %v328_v51  ;;  %v352_v41 = vsel %vm225_vm1, %v745_v52, 0.0 }
 0x18d   :  { %528 = vpow2.f32 %v302_v47  ;;  %v318_v55 = vmul.f32 1.442695, %v288_v44 }
 0x18e   :  { %v747_v53 = vpop.eup %518  ;;  %v320_v54 = vmul.f32 1.442695, %v289_v40 }
 0x18f   :  { %v337_v56 = vsel %vm225_vm1, %v747_v53, 0.0  ;;  %v753_v45 = vpop.eup %520 }
 0x190   :  { %530 = vpow2.f32 %v320_v54  ;;  %338 = vadd.xlane.f32.xlu1 %v337_v56  ;;  %353 = vadd.xlane.f32.xlu0 %v352_v41  ;;  %v334_v59 = vsel %vm225_vm1, %v753_v45, 0.0 }
 0x191   :  { %532 = vpow2.f32 %v318_v55 }
 0x192   :  { %v755_v57 = vpop.eup %522 }
 0x193   :  { %v361_v58 = vsel %vm225_vm1, %v755_v57, 0.0  ;;  %v761_v60 = vpop.eup %524 }
 0x194   :  { %362 = vadd.xlane.f32.xlu1 %v361_v58  ;;  %335 = vadd.xlane.f32.xlu0 %v334_v59  ;;  %v358_v63 = vsel %vm225_vm1, %v761_v60, 0.0 }
 0x196   :  { %v763_v61 = vpop.eup %526 }
 0x197   :  { %v343_v62 = vsel %vm225_vm1, %v763_v61, 0.0  ;;  %v769_v0 = vpop.eup %528 }
 0x198   :  { %344 = vadd.xlane.f32.xlu1 %v343_v62  ;;  %359 = vadd.xlane.f32.xlu0 %v358_v63  ;;  %v340_v3 = vsel %vm225_vm1, %v769_v0, 0.0 }
 0x19a   :  { %v771_v1 = vpop.eup %530 }
 0x19b   :  { %v367_v2 = vsel %vm225_vm1, %v771_v1, 0.0  ;;  %v777_v4 = vpop.eup %532 }
 0x19c   :  { %368 = vadd.xlane.f32.xlu1 %v367_v2  ;;  %341 = vadd.xlane.f32.xlu0 %v340_v3  ;;  %v364_v5 = vsel %vm225_vm1, %v777_v4, 0.0 }
 0x1a0   :  { %365 = vadd.xlane.f32.xlu0 %v364_v5 }
 0x20c   :  { %v327_v6 = vpop.xlane.xlu1 %326 }
 0x20d   :  { %534 = vrcp.f32 %v327_v6 }
 0x210   :  { %v324_v7 = vpop.xlane.xlu0 %323  ;;  %v351_v8 = vpop.xlane.xlu1 %350 }
 0x211   :  { %536 = vrcp.f32 %v324_v7 }
 0x212   :  { %538 = vrcp.f32 %v351_v8 }
 0x214   :  { %v348_v9 = vpop.xlane.xlu0 %347  ;;  %v333_v10 = vpop.xlane.xlu1 %332 }
 0x215   :  { %540 = vrcp.f32 %v348_v9 }
 0x216   :  { %542 = vrcp.f32 %v333_v10 }
 0x217   :  { %v535_v11 = vpop.eup %534 }
 0x218   :  { %v373_v12 = vmul.f32 %v535_v11, %v709_v13  ;;  %v357_v14 = vpop.xlane.xlu1 %356 }
 0x219   :  { %v330_v15 = vpop.xlane.xlu0 %329  ;;  %544 = vrcp.f32 %v357_v14 }
 0x21a   :  { %403 = vst.msk [vmem:[%s863_s2 + $0x8] sm:$0xff] %vm225_vm1, %v373_v12  ;;  %546 = vrcp.f32 %v330_v15 }
 0x21b   :  { %v537_v16 = vpop.eup %536 }
 0x21c   :  { %v539_v17 = vpop.eup %538  ;;  %v371_v18 = vmul.f32 %v537_v16, %v717_v21 }
 0x21d   :  { %v389_v19 = vmul.f32 %v539_v17, %v715_v20  ;;  %v339_v22 = vpop.xlane.xlu1 %338  ;;  %v354_v23 = vpop.xlane.xlu0 %353 }
 0x21e   :  { %402 = vst.msk [vmem:[%s863_s2] sm:$0xff] %vm225_vm1, %v371_v18  ;;  %548 = vrcp.f32 %v339_v22 }
 0x21f   :  { %v541_v13 = vpop.eup %540  ;;  %411 = vst.msk [vmem:[%s863_s2 + $0x48] sm:$0xff] %vm225_vm1, %v389_v19  ;;  %550 = vrcp.f32 %v354_v23 }
 0x220   :  { %v543_v24 = vpop.eup %542  ;;  %v387_v21 = vmul.f32 %v541_v13, %v727_v31 }
 0x221   :  { %v377_v20 = vmul.f32 %v543_v24, %v725_v30  ;;  %v363_v25 = vpop.xlane.xlu1 %362  ;;  %v336_v26 = vpop.xlane.xlu0 %335 }
 0x222   :  { %410 = vst.msk [vmem:[%s863_s2 + $0x40] sm:$0xff] %vm225_vm1, %v387_v21  ;;  %552 = vrcp.f32 %v363_v25 }
 0x223   :  { %405 = vst.msk [vmem:[%s863_s2 + $0x18] sm:$0xff] %vm225_vm1, %v377_v20  ;;  %554 = vrcp.f32 %v336_v26  ;;  %v545_v27 = vpop.eup %544 }
 0x224   :  { %v547_v28 = vpop.eup %546  ;;  %v393_v29 = vmul.f32 %v545_v27, %v731_v36 }
 0x225   :  { %v345_v31 = vpop.xlane.xlu1 %344  ;;  %v360_v30 = vpop.xlane.xlu0 %359  ;;  %v375_v32 = vmul.f32 %v547_v28, %v737_v46 }
 0x226   :  { %556 = vrcp.f32 %v345_v31  ;;  %413 = vst.msk [vmem:[%s863_s2 + $0x58] sm:$0xff] %vm225_vm1, %v393_v29 }
 0x227   :  { %558 = vrcp.f32 %v360_v30  ;;  %404 = vst.msk [vmem:[%s863_s2 + $0x10] sm:$0xff] %vm225_vm1, %v375_v32 }
 0x228   :  { %v549_v33 = vpop.eup %548 }
 0x229   :  { %v551_v34 = vpop.eup %550  ;;  %v381_v35 = vmul.f32 %v549_v33, %v747_v53  ;;  %v369_v37 = vpop.xlane.xlu1 %368 }
 0x22a   :  { %v342_v36 = vpop.xlane.xlu0 %341  ;;  %v391_v38 = vmul.f32 %v551_v34, %v745_v52  ;;  %560 = vrcp.f32 %v369_v37 }
 0x22b   :  { %407 = vst.msk [vmem:[%s863_s2 + $0x28] sm:$0xff] %vm225_vm1, %v381_v35  ;;  %562 = vrcp.f32 %v342_v36 }
 0x22c   :  { %v553_v39 = vpop.eup %552  ;;  %412 = vst.msk [vmem:[%s863_s2 + $0x50] sm:$0xff] %vm225_vm1, %v391_v38 }
 0x22d   :  { %v555_v42 = vpop.eup %554  ;;  %v397_v43 = vmul.f32 %v553_v39, %v755_v57 }
 0x22e   :  { %v366_v46 = vpop.xlane.xlu0 %365  ;;  %v379_v47 = vmul.f32 %v555_v42, %v753_v45 }
 0x22f   :  { %564 = vrcp.f32 %v366_v46  ;;  %415 = vst.msk [vmem:[%s863_s2 + $0x68] sm:$0xff] %vm225_vm1, %v397_v43 }
 0x230   :  { %v557_v48 = vpop.eup %556  ;;  %406 = vst.msk [vmem:[%s863_s2 + $0x20] sm:$0xff] %vm225_vm1, %v379_v47 }
 0x231   :  { %v559_v49 = vpop.eup %558  ;;  %v385_v50 = vmul.f32 %v557_v48, %v763_v61 }
 0x232   :  { %v395_v40 = vmul.f32 %v559_v49, %v761_v60 }
 0x233   :  { %409 = vst.msk [vmem:[%s863_s2 + $0x38] sm:$0xff] %vm225_vm1, %v385_v50 }
 0x234   :  { %v561_v44 = vpop.eup %560  ;;  %414 = vst.msk [vmem:[%s863_s2 + $0x60] sm:$0xff] %vm225_vm1, %v395_v40 }
 0x235   :  { %v563_v51 = vpop.eup %562  ;;  %v401_v52 = vmul.f32 %v561_v44, %v771_v1 }
 0x236   :  { %v383_v53 = vmul.f32 %v563_v51, %v769_v0 }
 0x237   :  { %417 = vst.msk [vmem:[%s863_s2 + $0x78] sm:$0xff] %vm225_vm1, %v401_v52 }
 0x238   :  { %408 = vst.msk [vmem:[%s863_s2 + $0x30] sm:$0xff] %vm225_vm1, %v383_v53 }
 0x239   :  { %v565_v54 = vpop.eup %564 }
 0x23a   :  { %v399_v55 = vmul.f32 %v565_v54, %v777_v4 }
 0x23c   :  { %416 = vst.msk [vmem:[%s863_s2 + $0x70] sm:$0xff] %vm225_vm1, %v399_v55 }

</bundles_post_ra>
